<compile_context>
chip_gen: v5e
topology: v5e:2x2
jax: 0.10.0
libtpu: 0.0.40
codegen_flags: <defaults>
</compile_context>

<pallas_src>
import functools

import jax
import jax.numpy as jnp
from jax import lax
from jax.experimental import pallas as pl
from jax.experimental.pallas import tpu as pltpu


def ring_loss_kernel(radius_ref, x_ref, part_ref, c_ref, *,
                     n_rows, block_n, tiles_per_split, lane_dense):
    """Accumulates per-split partials of the RingLoss reduction.

    part_ref is this split's resident (8, 128) f32 VMEM output block:
      row 0: per-lane partial sums of (norm - c)
      row 1: per-lane partial sums of (norm - c)^2
      row 2: the shift c, broadcast across lanes
    """
    p = pl.program_id(0)                       # split (parallel across TensorCores)
    i = pl.program_id(1)                       # tile within split (reduction axis)
    global_tile = p * tiles_per_split + i
    tile_start = global_tile * block_n
    n_full_tiles = n_rows // block_n           # tiles that contain no invalid rows

    xf = x_ref[...].astype(jnp.float32)        # (block_n, d)

    if lane_dense:
        groups = block_n // 128
        x3 = xf.reshape(groups, 128, xf.shape[-1])
        # Lane-dense per-row norms: (groups, 128) -> sqrt uses full EUP vregs.
        norms = jnp.sqrt(jnp.sum(x3 * x3, axis=-1))
        local_rows = (lax.broadcasted_iota(jnp.int32, (groups, 128), 0) * 128
                      + lax.broadcasted_iota(jnp.int32, (groups, 128), 1))
    else:
        # Fallback for tiny / oddly sized batches: lane-sparse (block_n, 1) column.
        norms = jnp.sqrt(jnp.sum(xf * xf, axis=-1, keepdims=True))
        local_rows = lax.broadcasted_iota(jnp.int32, norms.shape, 0)

    def accumulate(shifted):
        t1 = jnp.sum(shifted, axis=0, keepdims=True)
        t2 = jnp.sum(shifted * shifted, axis=0, keepdims=True)
        if not lane_dense:                     # place the scalar partial in lane 0
            lane0 = lax.broadcasted_iota(jnp.int32, (1, 128), 1) == 0
            t1 = jnp.where(lane0, t1, 0.0)
            t2 = jnp.where(lane0, t2, 0.0)
        part_ref[pl.ds(0, 1), :] = part_ref[pl.ds(0, 1), :] + t1
        part_ref[pl.ds(1, 1), :] = part_ref[pl.ds(1, 1), :] + t2

    @pl.when(i == 0)
    def _init():
        part_ref[...] = jnp.zeros_like(part_ref)
        # Shift for numerically stable accumulation: the given radius if already
        # valid, else the mean norm of this split's first tile (masked).
        r_in = radius_ref[0, 0]
        valid0 = (local_rows + tile_start) < n_rows
        cnt = jnp.maximum(jnp.minimum(n_rows - tile_start, block_n), 1)
        tile_mean = jnp.sum(jnp.where(valid0, norms, 0.0)) / cnt.astype(jnp.float32)
        c0 = jnp.where(r_in < 0.0, tile_mean, r_in)
        c_ref[0] = c0
        part_ref[pl.ds(2, 1), :] = jnp.full((1, 128), c0, dtype=jnp.float32)

    c = c_ref[0]

    @pl.when(global_tile < n_full_tiles)       # interior tiles: no masking work
    def _full_tile():
        accumulate(norms - c)

    @pl.when(global_tile >= n_full_tiles)      # partial last tile / padded split tile
    def _edge_tile():
        valid = (local_rows + tile_start) < n_rows
        accumulate(jnp.where(valid, norms - c, 0.0))


def _vmem_budget_bytes():
    try:
        kind = jax.devices()[0].device_kind.lower()
    except Exception:
        kind = ""
    if "v7" in kind:
        return 44 << 20    # v7x: 64 MiB physical VMEM -> leave headroom
    return 64 << 20        # v4/v5e/v5p/v6e: 128 MiB physical VMEM


def _num_core_splits(n_tiles):
    if n_tiles < 2:
        return 1
    try:
        kind = jax.devices()[0].device_kind.lower()
    except Exception:
        kind = ""
    # 2 TensorCores per chip on v4 / v5p / v7x; 1 on v5e / v6e.
    if any(tag in kind for tag in ("v7", "v5p", "v4")):
        return 2
    # Single-core chips: the 2-way split is free when it divides evenly (and keeps
    # the code path exercised); skip it when it would add a duplicated padded tile.
    return 2 if n_tiles % 2 == 0 else 1


def _choose_block_n(n, d, itemsize, vmem_budget):
    """Rows per x tile: as big as the VMEM budget / ~16 MiB target allows."""
    sublane = max(8, 32 // max(1, itemsize))               # f32:8  bf16:16  int8:32
    per_row_live = d * (2 * itemsize + 4)                  # 2 pipeline bufs + f32 work
    rows_budget = max(sublane, int((vmem_budget * 2 // 3) // max(1, per_row_live)))
    rows_target = max(sublane, (16 << 20) // max(1, d * itemsize))
    bn = min(rows_budget, rows_target)
    if bn >= n:
        # Whole batch fits in one tile.  For big-but-odd n keep the bulk tile a
        # multiple of 128 (lane-dense sqrt) and let masking cover the tail tile.
        if n >= 1024 and n % 128 != 0:
            return (n // 128) * 128
        return n
    if bn >= 128:
        return (bn // 128) * 128                           # lane-dense + sublane aligned
    return max(sublane, (bn // sublane) * sublane)         # huge-d fallback


def ring_loss(x, radius, loss_weight=1.0, block_n=None, num_splits=None):
    """Pallas RingLoss forward (type='auto').

    x: (N, D) features; radius: (1, 1) parameter (negative => "uninitialized").
    Returns (loss_scalar, updated_radius_scalar) — the second output mirrors the
    module's in-place radius update.
    """
    n, d = x.shape
    itemsize = jnp.dtype(x.dtype).itemsize
    vmem_budget = _vmem_budget_bytes()
    if block_n is None:
        block_n = _choose_block_n(n, d, itemsize, vmem_budget)
    n_tiles = pl.cdiv(n, block_n)
    if num_splits is None:
        num_splits = _num_core_splits(n_tiles)
    tiles_per_split = pl.cdiv(n_tiles, num_splits)
    lane_dense = (block_n % 128 == 0)

    kernel = functools.partial(
        ring_loss_kernel, n_rows=n, block_n=block_n,
        tiles_per_split=tiles_per_split, lane_dense=lane_dense)

    def x_index_map(p, i):
        # Clamp padded grid steps (when n_tiles doesn't divide evenly across the
        # splits) onto the last real tile; the kernel masks those rows to zero.
        return (jnp.minimum(p * tiles_per_split + i, n_tiles - 1), 0)

    tile_bytes = block_n * d * itemsize
    x_spec = pl.BlockSpec((block_n, d), x_index_map)
    if tile_bytes <= (2 << 20) and n_tiles >= 3 and hasattr(pl, "Buffered"):
        try:   # deeper pipelining hides per-step overhead for small tiles
            x_spec = pl.BlockSpec((block_n, d), x_index_map,
                                  pipeline_mode=pl.Buffered(3))
        except TypeError:
            pass

    cost = pl.CostEstimate(
        flops=3 * n * d,                   # square + reduce-adds (approx)
        transcendentals=n,                 # one sqrt per row
        bytes_accessed=n * d * itemsize + num_splits * 8 * 128 * 4 + 8,
    )

    parts = pl.pallas_call(
        kernel,
        out_shape=jax.ShapeDtypeStruct((num_splits * 8, 128), jnp.float32),
        grid=(num_splits, tiles_per_split),
        in_specs=[
            pl.BlockSpec(memory_space=pltpu.MemorySpace.SMEM),   # radius (1,1) scalar
            x_spec,                                              # streamed x row tiles
        ],
        out_specs=pl.BlockSpec((8, 128), lambda p, i: (p, 0)),   # per-split partials
        scratch_shapes=[pltpu.SMEM((1,), jnp.float32)],          # shift c (per split)
        compiler_params=pltpu.CompilerParams(
            dimension_semantics=("parallel", "arbitrary"),
            vmem_limit_bytes=vmem_budget),
        cost_estimate=cost,
    )(radius, x)

    # Tiny finalize in JAX: combine the per-split shifted partials.
    parts = parts.reshape(num_splits, 8, 128)
    t1 = jnp.sum(parts[:, 0, :], axis=-1)                  # sum(norm - c) per split
    t2 = jnp.sum(parts[:, 1, :], axis=-1)                  # sum((norm - c)^2) per split
    c = parts[:, 2, 0]                                     # per-split shift
    rows_per_split = tiles_per_split * block_n
    counts = jnp.asarray(
        [float(max(0, min(n, (s + 1) * rows_per_split) - s * rows_per_split))
         for s in range(num_splits)], dtype=jnp.float32)   # valid rows per split
    n_f = jnp.float32(n)
    mean_norm = jnp.sum(t1 + counts * c) / n_f
    r_in = radius[0, 0]
    r = jnp.where(r_in < 0.0, mean_norm, r_in)             # PyTorch: fill radius w/ mean
    delta = r - c
    sq_sum = jnp.sum(t2 - 2.0 * delta * t1 + counts * delta * delta)
    denom = jnp.maximum(mean_norm, jnp.float32(0.5))       # clamp(mean, min=0.5)
    loss = sq_sum / (n_f * denom * denom) * jnp.float32(loss_weight)
    return loss, r


def ring_loss_ref(x, radius, loss_weight=1.0):
    """Pure-JAX reference matching the PyTorch forward (type='auto')."""
    norms = jnp.sqrt(jnp.sum(x.astype(jnp.float32) ** 2, axis=1))
    mean_norm = jnp.mean(norms)
    r = jnp.where(radius[0, 0] < 0.0, mean_norm, radius[0, 0])
    diff = (norms - r) / jnp.maximum(mean_norm, 0.5)
    return jnp.mean(diff * diff) * loss_weight, r


if __name__ == "__main__":
    key = jax.random.PRNGKey(0)
    k1, k2 = jax.random.split(key)

    # 1) Small batch, uninitialized radius (-1): single full-extent tile,
    #    lane-sparse fallback path, no core split.
    N, D = 16, 32
    x = jax.random.normal(k1, (N, D), dtype=jnp.float32)
    radius = jnp.full((1, 1), -1.0, dtype=jnp.float32)     # Parameter(1).fill_(-1)
    loss, new_radius = ring_loss(x, radius, loss_weight=1.0)
    loss, new_radius = jax.block_until_ready((loss, new_radius))
    loss_r, radius_r = ring_loss_ref(x, radius, loss_weight=1.0)
    assert jnp.allclose(loss, loss_r, rtol=5e-4, atol=1e-6), (loss, loss_r)
    assert jnp.allclose(new_radius, radius_r, rtol=5e-4, atol=1e-6), (new_radius, radius_r)

    # 2) Positive radius, forced small tiles + forced 2-way split: lane-dense path,
    #    partial last tile, padded duplicate tile (3 real tiles on a (2,2) grid),
    #    and Buffered(3) pipelining.
    N2 = 300
    x2 = jax.random.normal(k2, (N2, D), dtype=jnp.float32) * 1.5
    r2 = jnp.reshape(new_radius, (1, 1))
    loss2, rad2 = ring_loss(x2, r2, loss_weight=1.0, block_n=128, num_splits=2)
    loss2, rad2 = jax.block_until_ready((loss2, rad2))
    loss2_r, rad2_r = ring_loss_ref(x2, r2, loss_weight=1.0)
    assert jnp.allclose(loss2, loss2_r, rtol=5e-4, atol=1e-6), (loss2, loss2_r)
    assert jnp.allclose(rad2, rad2_r, rtol=5e-4, atol=1e-6), (rad2, rad2_r)

    # 3) Uninitialized radius + 2-way split with per-split data-derived shifts,
    #    lane-dense tiles with 2 sublane groups (block_n=256), loss_weight != 1.
    radius3 = jnp.full((1, 1), -1.0, dtype=jnp.float32)
    loss3, rad3 = ring_loss(x2, radius3, loss_weight=0.5, block_n=256, num_splits=2)
    loss3, rad3 = jax.block_until_ready((loss3, rad3))
    loss3_r, rad3_r = ring_loss_ref(x2, radius3, loss_weight=0.5)
    assert jnp.allclose(loss3, loss3_r, rtol=5e-4, atol=1e-6), (loss3, loss3_r)
    assert jnp.allclose(rad3, rad3_r, rtol=5e-4, atol=1e-6), (rad3, rad3_r)

    print("KERNEL_OK")
</pallas_src>

<mosaic_0001>
module attributes {stable_mosaic.version = 11 : i64} {
  func.func @ring_loss_kernel(%arg0: i32, %arg1: i32, %arg2: memref<1x1xf32, #tpu.memory_space<smem>>, %arg3: memref<16x32xf32, #tpu.memory_space<vmem>>, %arg4: memref<8x128xf32, #tpu.memory_space<vmem>>, %arg5: memref<1xf32, #tpu.memory_space<smem>>) attributes {dimension_semantics = [#tpu.dimension_semantics<parallel>, #tpu.dimension_semantics<arbitrary>], iteration_bounds = array<i64: 1, 1>, scalar_prefetch = 0 : i64, scratch_operands = 1 : i64, tpu.core_type = #tpu.core_type<tc>, window_params = [{transform_indices = @transform_0, window_bounds = array<i64: 1, 1>}, {transform_indices = @transform_1, window_bounds = array<i64: 16, 32>}, {transform_indices = @transform_2, window_bounds = array<i64: 8, 128>}]} {
    %c1_i32 = arith.constant 1 : i32
    %0 = arith.muli %arg0, %c1_i32 : i32
    %1 = arith.addi %0, %arg1 : i32
    %c16_i32 = arith.constant 16 : i32
    %2 = arith.muli %1, %c16_i32 : i32
    %c0 = arith.constant 0 : index
    %c0_0 = arith.constant 0 : index
    %3 = vector.load %arg3[%c0, %c0_0] : memref<16x32xf32, #tpu.memory_space<vmem>>, vector<16x32xf32>
    %4 = arith.mulf %3, %3 : vector<16x32xf32>
    %cst = arith.constant dense<0.000000e+00> : vector<16xf32>
    %5 = vector.multi_reduction <add>, %4, %cst [1] : vector<16x32xf32> to vector<16xf32>
    %6 = vector.shape_cast %5 : vector<16xf32> to vector<16x1xf32>
    %7 = math.sqrt %6 : vector<16x1xf32>
    %8 = tpu.iota {dimensions = array<i32: 0>} : vector<16x1xi32>
    %c0_i32 = arith.constant 0 : i32
    %9 = arith.cmpi eq, %arg1, %c0_i32 : i32
    %10 = arith.extui %9 : i1 to i32
    %c0_i32_1 = arith.constant 0 : i32
    %11 = arith.cmpi ne, %10, %c0_i32_1 : i32
    scf.if %11 {
      %cst_7 = arith.constant 0.000000e+00 : f32
      %19 = vector.broadcast %cst_7 : f32 to vector<8x128xf32>
      %c0_8 = arith.constant 0 : index
      %c0_9 = arith.constant 0 : index
      %20 = vector.load %arg4[%c0_8, %c0_9] : memref<8x128xf32, #tpu.memory_space<vmem>>, vector<8x128xf32>
      tpu.vector_store %arg4[%c0_8, %c0_9], %19 {strides = array<i32>} : memref<8x128xf32, #tpu.memory_space<vmem>>, vector<8x128xf32>,
      %c0_10 = arith.constant 0 : index
      %c0_11 = arith.constant 0 : index
      %21 = memref.load %arg2[%c0_10, %c0_11] : memref<1x1xf32, #tpu.memory_space<smem>>
      %22 = vector.broadcast %2 : i32 to vector<16x1xi32>
      %23 = arith.addi %8, %22 : vector<16x1xi32>
      %c16_i32_12 = arith.constant 16 : i32
      %24 = vector.broadcast %c16_i32_12 : i32 to vector<16x1xi32>
      %25 = arith.cmpi slt, %23, %24 : vector<16x1xi32>
      %c16_i32_13 = arith.constant 16 : i32
      %26 = arith.subi %c16_i32_13, %2 : i32
      %c16_i32_14 = arith.constant 16 : i32
      %27 = arith.minsi %26, %c16_i32_14 : i32
      %c1_i32_15 = arith.constant 1 : i32
      %28 = arith.maxsi %27, %c1_i32_15 : i32
      %cst_16 = arith.constant 0.000000e+00 : f32
      %29 = vector.broadcast %cst_16 : f32 to vector<16x1xf32>
      %30 = arith.select %25, %7, %29 : vector<16x1xi1>, vector<16x1xf32>
      %31 = vector.shape_cast %30 : vector<16x1xf32> to vector<1x16x1xf32>
      %cst_17 = arith.constant dense<0.000000e+00> : vector<1xf32>
      %32 = vector.multi_reduction <add>, %31, %cst_17 [1, 2] : vector<1x16x1xf32> to vector<1xf32>
      %33 = vector.shape_cast %32 : vector<1xf32> to vector<1x1x1xf32>
      %34 = vector.extract %33[0, 0, 0] : f32 from vector<1x1x1xf32>
      %35 = arith.sitofp %28 : i32 to f32
      %36 = arith.divf %34, %35 : f32
      %cst_18 = arith.constant 0.000000e+00 : f32
      %37 = arith.cmpf olt, %21, %cst_18 : f32
      %38 = arith.select %37, %36, %21 : f32
      %c0_19 = arith.constant 0 : index
      %39 = memref.load %arg5[%c0_19] : memref<1xf32, #tpu.memory_space<smem>>
      memref.store %38, %arg5[%c0_19] : memref<1xf32, #tpu.memory_space<smem>>
      %40 = vector.broadcast %38 : f32 to vector<1x128xf32>
      %c2 = arith.constant 2 : index
      %c0_20 = arith.constant 0 : index
      %41 = vector.load %arg4[%c2, %c0_20] : memref<8x128xf32, #tpu.memory_space<vmem>>, vector<1x128xf32>
      tpu.vector_store %arg4[%c2, %c0_20], %40 {strides = array<i32>} : memref<8x128xf32, #tpu.memory_space<vmem>>, vector<1x128xf32>,
    } else {
    }
    %c0_2 = arith.constant 0 : index
    %12 = memref.load %arg5[%c0_2] : memref<1xf32, #tpu.memory_space<smem>>
    %c1_i32_3 = arith.constant 1 : i32
    %13 = arith.cmpi slt, %1, %c1_i32_3 : i32
    %14 = arith.extui %13 : i1 to i32
    %c0_i32_4 = arith.constant 0 : i32
    %15 = arith.cmpi ne, %14, %c0_i32_4 : i32
    scf.if %15 {
      %19 = vector.broadcast %12 : f32 to vector<16x1xf32>
      %20 = arith.subf %7, %19 : vector<16x1xf32>
      %cst_7 = arith.constant dense<0.000000e+00> : vector<1xf32>
      %21 = vector.multi_reduction <add>, %20, %cst_7 [0] : vector<16x1xf32> to vector<1xf32>
      %22 = vector.shape_cast %21 : vector<1xf32> to vector<1x1xf32>
      %23 = arith.mulf %20, %20 : vector<16x1xf32>
      %cst_8 = arith.constant dense<0.000000e+00> : vector<1xf32>
      %24 = vector.multi_reduction <add>, %23, %cst_8 [0] : vector<16x1xf32> to vector<1xf32>
      %25 = vector.shape_cast %24 : vector<1xf32> to vector<1x1xf32>
      %26 = tpu.iota {dimensions = array<i32: 1>} : vector<1x128xi32>
      %c0_i32_9 = arith.constant 0 : i32
      %27 = vector.broadcast %c0_i32_9 : i32 to vector<1x128xi32>
      %28 = arith.cmpi eq, %26, %27 : vector<1x128xi32>
      %cst_10 = arith.constant 0.000000e+00 : f32
      %29 = vector.shape_cast %22 : vector<1x1xf32> to vector<1x1xf32>
      %30 = vector.broadcast %29 : vector<1x1xf32> to vector<1x128xf32>
      %31 = vector.broadcast %cst_10 : f32 to vector<1x128xf32>
      %32 = arith.select %28, %30, %31 : vector<1x128xi1>, vector<1x128xf32>
      %cst_11 = arith.constant 0.000000e+00 : f32
      %33 = vector.shape_cast %25 : vector<1x1xf32> to vector<1x1xf32>
      %34 = vector.broadcast %33 : vector<1x1xf32> to vector<1x128xf32>
      %35 = vector.broadcast %cst_11 : f32 to vector<1x128xf32>
      %36 = arith.select %28, %34, %35 : vector<1x128xi1>, vector<1x128xf32>
      %c0_12 = arith.constant 0 : index
      %c0_13 = arith.constant 0 : index
      %37 = vector.load %arg4[%c0_12, %c0_13] : memref<8x128xf32, #tpu.memory_space<vmem>>, vector<1x128xf32>
      %38 = arith.addf %37, %32 : vector<1x128xf32>
      %c0_14 = arith.constant 0 : index
      %c0_15 = arith.constant 0 : index
      %39 = vector.load %arg4[%c0_14, %c0_15] : memref<8x128xf32, #tpu.memory_space<vmem>>, vector<1x128xf32>
      tpu.vector_store %arg4[%c0_14, %c0_15], %38 {strides = array<i32>} : memref<8x128xf32, #tpu.memory_space<vmem>>, vector<1x128xf32>,
      %c1 = arith.constant 1 : index
      %c0_16 = arith.constant 0 : index
      %40 = vector.load %arg4[%c1, %c0_16] : memref<8x128xf32, #tpu.memory_space<vmem>>, vector<1x128xf32>
      %41 = arith.addf %40, %36 : vector<1x128xf32>
      %c1_17 = arith.constant 1 : index
      %c0_18 = arith.constant 0 : index
      %42 = vector.load %arg4[%c1_17, %c0_18] : memref<8x128xf32, #tpu.memory_space<vmem>>, vector<1x128xf32>
      tpu.vector_store %arg4[%c1_17, %c0_18], %41 {strides = array<i32>} : memref<8x128xf32, #tpu.memory_space<vmem>>, vector<1x128xf32>,
    } else {
    }
    %c1_i32_5 = arith.constant 1 : i32
    %16 = arith.cmpi sge, %1, %c1_i32_5 : i32
    %17 = arith.extui %16 : i1 to i32
    %c0_i32_6 = arith.constant 0 : i32
    %18 = arith.cmpi ne, %17, %c0_i32_6 : i32
    scf.if %18 {
      %19 = vector.broadcast %2 : i32 to vector<16x1xi32>
      %20 = arith.addi %8, %19 : vector<16x1xi32>
      %c16_i32_7 = arith.constant 16 : i32
      %21 = vector.broadcast %c16_i32_7 : i32 to vector<16x1xi32>
      %22 = arith.cmpi slt, %20, %21 : vector<16x1xi32>
      %23 = vector.broadcast %12 : f32 to vector<16x1xf32>
      %24 = arith.subf %7, %23 : vector<16x1xf32>
      %cst_8 = arith.constant 0.000000e+00 : f32
      %25 = vector.broadcast %cst_8 : f32 to vector<16x1xf32>
      %26 = arith.select %22, %24, %25 : vector<16x1xi1>, vector<16x1xf32>
      %cst_9 = arith.constant dense<0.000000e+00> : vector<1xf32>
      %27 = vector.multi_reduction <add>, %26, %cst_9 [0] : vector<16x1xf32> to vector<1xf32>
      %28 = vector.shape_cast %27 : vector<1xf32> to vector<1x1xf32>
      %29 = arith.mulf %26, %26 : vector<16x1xf32>
      %cst_10 = arith.constant dense<0.000000e+00> : vector<1xf32>
      %30 = vector.multi_reduction <add>, %29, %cst_10 [0] : vector<16x1xf32> to vector<1xf32>
      %31 = vector.shape_cast %30 : vector<1xf32> to vector<1x1xf32>
      %32 = tpu.iota {dimensions = array<i32: 1>} : vector<1x128xi32>
      %c0_i32_11 = arith.constant 0 : i32
      %33 = vector.broadcast %c0_i32_11 : i32 to vector<1x128xi32>
      %34 = arith.cmpi eq, %32, %33 : vector<1x128xi32>
      %cst_12 = arith.constant 0.000000e+00 : f32
      %35 = vector.shape_cast %28 : vector<1x1xf32> to vector<1x1xf32>
      %36 = vector.broadcast %35 : vector<1x1xf32> to vector<1x128xf32>
      %37 = vector.broadcast %cst_12 : f32 to vector<1x128xf32>
      %38 = arith.select %34, %36, %37 : vector<1x128xi1>, vector<1x128xf32>
      %cst_13 = arith.constant 0.000000e+00 : f32
      %39 = vector.shape_cast %31 : vector<1x1xf32> to vector<1x1xf32>
      %40 = vector.broadcast %39 : vector<1x1xf32> to vector<1x128xf32>
      %41 = vector.broadcast %cst_13 : f32 to vector<1x128xf32>
      %42 = arith.select %34, %40, %41 : vector<1x128xi1>, vector<1x128xf32>
      %c0_14 = arith.constant 0 : index
      %c0_15 = arith.constant 0 : index
      %43 = vector.load %arg4[%c0_14, %c0_15] : memref<8x128xf32, #tpu.memory_space<vmem>>, vector<1x128xf32>
      %44 = arith.addf %43, %38 : vector<1x128xf32>
      %c0_16 = arith.constant 0 : index
      %c0_17 = arith.constant 0 : index
      %45 = vector.load %arg4[%c0_16, %c0_17] : memref<8x128xf32, #tpu.memory_space<vmem>>, vector<1x128xf32>
      tpu.vector_store %arg4[%c0_16, %c0_17], %44 {strides = array<i32>} : memref<8x128xf32, #tpu.memory_space<vmem>>, vector<1x128xf32>,
      %c1 = arith.constant 1 : index
      %c0_18 = arith.constant 0 : index
      %46 = vector.load %arg4[%c1, %c0_18] : memref<8x128xf32, #tpu.memory_space<vmem>>, vector<1x128xf32>
      %47 = arith.addf %46, %42 : vector<1x128xf32>
      %c1_19 = arith.constant 1 : index
      %c0_20 = arith.constant 0 : index
      %48 = vector.load %arg4[%c1_19, %c0_20] : memref<8x128xf32, #tpu.memory_space<vmem>>, vector<1x128xf32>
      tpu.vector_store %arg4[%c1_19, %c0_20], %47 {strides = array<i32>} : memref<8x128xf32, #tpu.memory_space<vmem>>, vector<1x128xf32>,
    } else {
    }
    return
  }
  func.func @transform_0(%arg0: i32, %arg1: i32) -> (i32, i32) {
    %c0_i32 = arith.constant 0 : i32
    %c0_i32_0 = arith.constant 0 : i32
    %c0_i32_1 = arith.constant 0 : i32
    return %c0_i32, %c0_i32_0 : i32, i32
  }
  func.func @transform_1(%arg0: i32, %arg1: i32) -> (i32, i32) {
    %c1_i32 = arith.constant 1 : i32
    %0 = arith.muli %arg0, %c1_i32 : i32
    %1 = arith.addi %0, %arg1 : i32
    %c0_i32 = arith.constant 0 : i32
    %2 = arith.minsi %1, %c0_i32 : i32
    %c0_i32_0 = arith.constant 0 : i32
    %c0_i32_1 = arith.constant 0 : i32
    return %2, %c0_i32_0 : i32, i32
  }
  func.func @transform_2(%arg0: i32, %arg1: i32) -> (i32, i32) {
    %c0_i32 = arith.constant 0 : i32
    %c0_i32_0 = arith.constant 0 : i32
    return %arg0, %c0_i32 : i32, i32
  }
}

</mosaic_0001>

<bundles_post_ra>
// kernel: tpu_custom_call.1
= control target key start
LH: loop header
LB: loop body
LE: loop exit
PB: predicated region body
PF: predicated region fallthrough
CT: control target
= control target key end

     0   :  { %8 = vsyncpa [#allocation5], 0  ;;  %s330_s0 = inlined_call_operand.<no memory space> [shape: f32[1,1], index: 0, kind: input, shape index: {}]   ;;  %s331_s1 = inlined_call_operand.hbm [shape: f32[16,32], index: 1, kind: input, shape index: {}]   ;;  %s332_s2 = inlined_call_operand.hbm [shape: f32[8,128], index: 2, kind: output, shape index: {}]  }
   0x1   :  { %9 = vsyncpa [#allocation6], 0  ;;  %s22_s11 = sshll.u32 %s331_s1, 4  ;;  %s297_s12 = smov [#allocation4]   ;;  %s23_s11 = int_to_ptr.hbm [resolvable:$true] %s22_s11 }
   0x2   :  { %s24_s13 = sshll.u32 %s297_s12, 4  ;;  %s298_s14 = smov 128   ;;  %s25_s13 = int_to_ptr.vmem [resolvable:$true] %s24_s13 }
   0x3   :  { %s299_s15 = smov 8  }
   0x4   :  { %30 = dma.hbm_to_vmem [thread:$0]  %s23_s11, 256, %s25_s13, [#allocation5], %s298_s14, %s298_s14, %s299_s15  }
   0x5   :  { %293 = dma.done.wait [#allocation5], 256  }
   0x6   :  { %294 = vsyncadd [#allocation5], 4294967040  ;;  %v41_v0 = vld [vmem:[#allocation4] sm:$0xff]  ;;  %vm45_vm0 = vcmask 261120   ;;  %v42_v2 = vld [vmem:[#allocation4 + $0x8] sm:$0xff]  ;;  %vm97_vm4 = vcmask 7168   ;;  %v158_v54 = vlaneseq }
   0x7   :  { %v43_v1 = vmul.f32 %v41_v0, %v41_v0  ;;  %v44_v4 = vmul.f32 %v42_v2, %v42_v2  ;;  %v300_v31 = vmov 16.0   ;;  %v301_v45 = vmov 0.0   ;;  %p128_p0 = scmp.lt.f32.partialorder %s330_s0, 0.0  ;;  %s217_s25 = sshll.u32 %s332_s2, 4  ;;  %s218_s25 = int_to_ptr.hbm [resolvable:$true] %s217_s25 }
   0x8   :  { %83 = vst [vmem:[#allocation7] sm:$0xff] %v301_v45  ;;  %v159_v59 = vand.u32 127, %v158_v54 }
   0x9   :  { %v46_v3 = vsel %vm45_vm0, %v43_v1, 0.0  ;;  %v49_v5 = vsel %vm45_vm0, %v44_v4, 0.0 }
   0xa   :  { %47 = vadd.xlane.f32.xlu0 %v46_v3  ;;  %vm160_vm7 = vcmp.eq.s32.totalorder %v159_v59, 0 }
   0xf   :  { %v163_v2 = vld [vmem:[#allocation7] sm:$0x1] }
  0x12   :  { %50 = vadd.xlane.f32.xlu0 %v49_v5  ;;  %v166_v5 = vld [vmem:[#allocation7 + $0x1] sm:$0x1] }
  0x7d   :  { %v48_v6 = vpop.xlane.xlu0 %47 }
  0x7e   :  { %239 = vrsqrt.f32 %v48_v6  ;;  %vm59_vm1 = vcmp.eq.f32.partialorder %v48_v6, inf  ;;  %v62_v22 = vand.u32 2147483648, %v48_v6  ;;  %vm61_vm2 = vcmp.eq.f32.partialorder %v48_v6, 0.0 }
  0x84   :  { %v240_v7 = vpop.eup %239 }
  0x85   :  { %v53_v8 = vmul.f32 %v240_v7, %v48_v6  ;;  %v51_v9 = vpop.xlane.xlu0 %50 }
  0x86   :  { %241 = vrsqrt.f32 %v51_v9  ;;  %vm71_vm3 = vcmp.eq.f32.partialorder %v51_v9, inf  ;;  %v74_v25 = vand.u32 2147483648, %v51_v9  ;;  %vm73_vm5 = vcmp.eq.f32.partialorder %v51_v9, 0.0 }
  0x87   :  { %v54_v10 = vmul.f32 %v240_v7, %v53_v8  ;;  %243 = vrcp.f32 %v300_v31 }
  0x89   :  { %v55_v11 = vmul.f32 0.5, %v54_v10 }
  0x8b   :  { %v56_v12 = vsub.f32 1.5, %v55_v11 }
  0x8c   :  { %v242_v13 = vpop.eup %241 }
  0x8d   :  { %v65_v14 = vmul.f32 %v242_v13, %v51_v9  ;;  %v57_v15 = vmul.f32 %v240_v7, %v56_v12  ;;  %v244_v32 = vpop.eup %243 }
  0x8e   :  { %v113_v33 = vmul.f32 16.0, %v244_v32  ;;  %vm118_vm6 = vweird.f32 %v244_v32 }
  0x8f   :  { %v66_v16 = vmul.f32 %v242_v13, %v65_v14  ;;  %v58_v17 = vmul.f32 %v57_v15, %v48_v6 }
  0x90   :  { %v114_v34 = vsub.f32 1.0, %v113_v33 }
  0x91   :  { %v67_v18 = vmul.f32 0.5, %v66_v16  ;;  %v60_v20 = vsel %vm59_vm1, %v48_v6, %v58_v17 }
  0x92   :  { %v63_v24 = vsel %vm61_vm2, %v62_v22, %v60_v20  ;;  %v115_v38 = vmul.f32 %v244_v32, %v114_v34 }
  0x93   :  { %v68_v19 = vsub.f32 1.5, %v67_v18  ;;  %v98_v28 = vsel %vm97_vm4, %v63_v24, 0.0 }
  0x94   :  { %v116_v41 = vadd.f32 %v244_v32, %v115_v38 }
  0x95   :  { %v69_v21 = vmul.f32 %v242_v13, %v68_v19 }
  0x96   :  { %v120_v44 = vsel %vm118_vm6, %v244_v32, %v116_v41 }
  0x97   :  { %v70_v23 = vmul.f32 %v69_v21, %v51_v9 }
  0x99   :  { %v72_v26 = vsel %vm71_vm3, %v51_v9, %v70_v23 }
  0x9a   :  { %v75_v27 = vsel %vm73_vm5, %v74_v25, %v72_v26 }
  0x9b   :  { %v99_v29 = vsel %vm97_vm4, %v75_v27, 0.0 }
  0x9c   :  { %v100_v30 = vadd.f32 %v99_v29, %v98_v28 }
  0x9e   :  { %101 = vadd.xlane.f32.xlu1 %v100_v30 }
 0x111   :  { %v102_v35 = vpop.xlane.xlu1 %101 }
 0x112   :  { %v103_v36 = vrot.slane %v102_v35, 4 }
 0x114   :  { %v104_v37 = vadd.f32 %v103_v36, %v102_v35 }
 0x116   :  { %v105_v39 = vrot.slane %v104_v37, 2 }
 0x118   :  { %v106_v40 = vadd.f32 %v105_v39, %v104_v37 }
 0x11a   :  { %v107_v42 = vrot.slane %v106_v40, 1 }
 0x11c   :  { %v108_v43 = vadd.f32 %v107_v42, %v106_v40 }
 0x11e   :  { %229 = vpush %v108_v43 }
 0x11f   :  { %231 = vpush %v120_v44 }
 0x14f   :  { %s230_s1 = spop %229 }
 0x150   :  { %s232_s18 = spop %231 }
 0x151   :  { %s127_s19 = smul.f32 %s232_s18, %s230_s1 }
 0x153   :  { %s334_s19 = smov (!%p128_p0, %s127_s19), %s330_s0  ;;  %s302_s0 = smov [#allocation7]  }
 0x154   :  { %v132_v46 = vstv %s334_s19  ;;  %s215_s22 = sshll.u32 %s302_s0, 4  ;;  %s216_s22 = int_to_ptr.vmem [resolvable:$true] %s215_s22 }
 0x155   :  { %133 = vst [vmem:[#allocation7 + $0x2] sm:$0x1] %v132_v46  ;;  %v140_v47 = vsub.f32 %v63_v24, %v132_v46  ;;  %v141_v48 = vsub.f32 %v75_v27, %v132_v46 }
 0x157   :  { %v142_v49 = vadd.f32 %v141_v48, %v140_v47  ;;  %v149_v50 = vmul.f32 %v140_v47, %v140_v47  ;;  %v150_v51 = vmul.f32 %v141_v48, %v141_v48 }
 0x159   :  { %v143_v52 = vrot.slane %v142_v49, 4  ;;  %v151_v53 = vadd.f32 %v150_v51, %v149_v50 }
 0x15b   :  { %v144_v55 = vadd.f32 %v143_v52, %v142_v49  ;;  %v152_v56 = vrot.slane %v151_v53, 4 }
 0x15d   :  { %v145_v57 = vrot.slane %v144_v55, 2  ;;  %v153_v58 = vadd.f32 %v152_v56, %v151_v53 }
 0x15f   :  { %v146_v60 = vadd.f32 %v145_v57, %v144_v55  ;;  %v154_v61 = vrot.slane %v153_v58, 2 }
 0x161   :  { %v147_v62 = vrot.slane %v146_v60, 1  ;;  %v155_v63 = vadd.f32 %v154_v61, %v153_v58 }
 0x163   :  { %v148_v0 = vadd.f32 %v147_v62, %v146_v60  ;;  %v156_v1 = vrot.slane %v155_v63, 1 }
 0x165   :  { %v157_v3 = vadd.f32 %v156_v1, %v155_v63  ;;  %v161_v4 = vsel %vm160_vm7, %v148_v0, 0.0 }
 0x166   :  { %v164_v6 = vadd.f32 %v163_v2, %v161_v4 }
 0x167   :  { %v162_v7 = vsel %vm160_vm7, %v157_v3, 0.0 }
 0x168   :  { %165 = vst [vmem:[#allocation7] sm:$0x1] %v164_v6  ;;  %v167_v8 = vadd.f32 %v166_v5, %v162_v7 }
 0x16a   :  { %168 = vst [vmem:[#allocation7 + $0x1] sm:$0x1] %v167_v8 }
 0x16b   :  { %220 = dma.vmem_to_hbm [thread:$0]  %s216_s22, 128, %s218_s25, [#allocation6]  }
 0x16c   :  { %295 = dma.done.wait [#allocation6], 128  }
 0x16d   :  { %296 = vsyncadd [#allocation6], 4294967168 }
 0x16e   :  { %225 = vsyncpa [#allocation5], 1 }
 0x16f   :  { %226 = vsyncpa [#allocation6], 1 }

</bundles_post_ra>
